<compile_context>
chip_gen: v6e
topology: v6e:2x2x1
jax: 0.10.0
libtpu: 0.0.40
codegen_flags: <defaults>
</compile_context>

<pallas_src>
import functools

import jax
import jax.numpy as jnp
from jax.experimental import pallas as pl
from jax.experimental.pallas import tpu as pltpu


def _vmem_capacity_bytes():
    """Physical VMEM of the local TPU generation (fallback: v7x's 64 MiB)."""
    try:
        info = pltpu.get_tpu_info()
    except Exception:
        return 64 << 20
    for attr in ("vmem_capacity_bytes", "vmem_bytes", "vmem_size_bytes"):
        try:
            val = int(getattr(info, attr))
            if val > 0:
                return val
        except Exception:
            continue
    return 64 << 20


def _block_spec(shape, index_map, buffers=None):
    """BlockSpec with optional N-deep pipelining (falls back if unsupported)."""
    if buffers is not None and hasattr(pl, "Buffered"):
        try:
            return pl.BlockSpec(shape, index_map, pipeline_mode=pl.Buffered(buffers))
        except TypeError:
            pass
    return pl.BlockSpec(shape, index_map)


def af_kernel(x_ref, snr_ref, w1m_ref, w1s_ref, b1_ref, w2t_ref, b2_ref, o_ref,
              *, use_mxu):
    # x_ref:   (bt, C, HW)      input tile (native dtype)
    # snr_ref: (B_pad, 1) f32   full zero-padded SNR column, sliced per step
    # w1m_ref: (C, hidden) f32 if use_mxu else (hidden, C) f32
    # w1s_ref: (1, hidden) f32  dense1 weight column for the SNR feature
    # b1_ref:  (1, hidden) f32
    # w2t_ref: (hidden, C) f32  dense2 weight transposed (C on lanes)
    # b2_ref:  (1, C) f32
    bt = x_ref.shape[0]

    # Global average pool over the flattened spatial axis (lane reduce), f32 accum.
    pooled = jnp.mean(x_ref[...].astype(jnp.float32), axis=-1)            # (bt, C)

    # Per-row SNR scalars: dynamic slice of the full (padded) column; always
    # in-bounds because the wrapper pads snr to grid*bt rows.
    start = pl.multiple_of(pl.program_id(0) * bt, bt)
    snr = snr_ref[pl.ds(start, bt), :]                                    # (bt, 1)

    if use_mxu:
        # hidden >= 8: run both dense layers on the (otherwise idle) MXU.
        h = jnp.dot(pooled, w1m_ref[...], preferred_element_type=jnp.float32)
        h = jnp.maximum(h + snr * w1s_ref[...] + b1_ref[...], 0.0)        # (bt, hidden)
        g = jnp.dot(h, w2t_ref[...], preferred_element_type=jnp.float32) + b2_ref[...]
    else:
        # Tiny hidden: unrolled VPU/XLU chain, C stays on the lane axis throughout.
        hidden = w1m_ref.shape[0]
        w1s = w1s_ref[...]
        b1v = b1_ref[...]
        g = jnp.broadcast_to(b2_ref[...], pooled.shape)                   # (bt, C)
        for k in range(hidden):
            hk = jnp.sum(pooled * w1m_ref[k:k + 1, :], axis=-1, keepdims=True)
            hk = jnp.maximum(hk + snr * w1s[0:1, k:k + 1] + b1v[0:1, k:k + 1], 0.0)
            g = g + hk * w2t_ref[k:k + 1, :]
    g = jax.nn.sigmoid(g)                                                 # (bt, C) f32

    # Streaming gate multiply: re-read x from VMEM (cheap vld, low vreg pressure),
    # in the native dtype so bf16 inputs stay bf16 on the store path.
    xv = x_ref[...]
    o_ref[...] = (xv * g.astype(xv.dtype)[:, :, None]).astype(o_ref.dtype)


def af_module(x, snr, w1, b1, w2, b2, *, target_block_bytes=None):
    """x: (B, C, H, W), snr: (B, 1).
    w1: (hidden, C+1), b1: (hidden,), w2: (C, hidden), b2: (C,)  (PyTorch Linear layout).
    """
    B, C, H, W = x.shape
    hidden = w1.shape[0]
    assert hidden >= 1, (
        "AFModule: dense1 has %d output features; need >= 1 "
        "(PyTorch uses input_channels // 16, so input_channels must be >= 16)" % hidden)
    assert w1.shape == (hidden, C + 1), w1.shape
    assert b1.shape == (hidden,), b1.shape
    assert w2.shape == (C, hidden), w2.shape
    assert b2.shape == (C,), b2.shape
    assert snr.shape == (B, 1), snr.shape
    HW = H * W
    itemsize = jnp.dtype(x.dtype).itemsize
    per_row = C * HW * itemsize                       # bytes of one batch row of x

    # Lane-dense layout: flatten spatial dims so the last dim is H*W (free view).
    x3 = x.reshape(B, C, HW)
    # TODO(synk): when HW % 128 != 0 but C % 128 == 0 a channels-last (B, HW, C)
    # layout would keep output stores unmasked; that needs NHWC activations from
    # the surrounding model, so unaligned HW runs with masked stores here.

    use_mxu = hidden >= 8                             # MXU is idle; use it once worthwhile
    w1_main = (jnp.transpose(w1[:, :C]) if use_mxu else w1[:, :C]).astype(jnp.float32)
    w1_s = jnp.transpose(w1[:, C:C + 1]).astype(jnp.float32)      # (1, hidden)
    b1_r = b1.reshape(1, hidden).astype(jnp.float32)
    w2_t = jnp.transpose(w2).astype(jnp.float32)                  # (hidden, C)
    b2_r = b2.reshape(1, C).astype(jnp.float32)
    # TODO(synk): hoist this weight prep out of the per-call path when the module
    # runs inside a step loop (it only changes when the parameters do).

    # --- Generation-aware budgets (v5e/v6e: 128 MiB VMEM, v7x: 64 MiB) ----------
    vmem_cap = _vmem_capacity_bytes()
    big_vmem = vmem_cap >= (96 << 20)
    if target_block_bytes is None:
        target_block_bytes = (6 << 20) if big_vmem else (2 << 20)
    budget = min(vmem_cap - (12 << 20), 100 << 20)    # headroom for compiler scratch

    # --- Batch block size --------------------------------------------------------
    # Prefer >= `desired_steps` grid steps (pipelining + megacore sharding) as long
    # as a block stays >= ~1 MiB; below that, per-step overhead / tiny DMAs dominate.
    min_block_bytes = 1 << 20
    desired_steps = 8
    bt_target = max(1, target_block_bytes // per_row)
    bt_steps = max(1, B // desired_steps)
    bt_min = max(1, -(-min_block_bytes // per_row))
    bt = min(B, max(bt_min, min(bt_target, bt_steps)))

    weight_bytes = 4 * (w1_main.size + w1_s.size + b1_r.size + w2_t.size + b2_r.size)
    misc_bytes = 1 << 20                              # snr column, scalars, slack

    def vmem_need(bt_, in_bufs_, out_bufs_):
        return (in_bufs_ + out_bufs_) * bt_ * per_row + 2 * weight_bytes + misc_bytes

    in_bufs, out_bufs = 2, 2
    if vmem_need(bt, in_bufs, out_bufs) > budget and bt > 1:
        bt = max(1, int((budget - 2 * weight_bytes - misc_bytes) // (4 * per_row)))
    if vmem_need(bt, in_bufs, out_bufs) > budget:
        # Even a single double-buffered batch row does not fit (huge C*HW):
        # fall back to single-buffered x/out DMAs so the kernel stays within VMEM.
        in_bufs = out_bufs = 1
        # TODO(synk): for per_row this large an inner HW tiling pass
        # (pltpu.emit_pipeline over the spatial axis) would restore pipelining.
    if bt > 8:
        bt -= bt % 8                                  # sublane-aligned snr slices / DMAs

    grid = pl.cdiv(B, bt)
    block_bytes = bt * per_row

    # Deeper input pipelining for small blocks, where DMA issue latency dominates.
    if (in_bufs == 2 and block_bytes <= (2 << 20) and grid >= 3
            and vmem_need(bt, 3, out_bufs) <= budget):
        in_bufs = 3

    # SNR: pass the whole (zero-padded to grid*bt rows) column once and slice it
    # per step inside the kernel -> no (8,128) block-shape constraint tied to bt
    # and no out-of-bounds reads on a partial trailing batch block.
    b_pad = grid * bt
    snr_f = snr.astype(jnp.float32)
    snr_pad = jnp.pad(snr_f, ((0, b_pad - B), (0, 0))) if b_pad != B else snr_f

    vmem_limit = int(max(32 << 20,
                         min(budget, vmem_need(bt, in_bufs, out_bufs) + (4 << 20))))

    cost = pl.CostEstimate(
        flops=2 * B * C * HW + 2 * B * (C + 1) * hidden + 2 * B * hidden * C,
        transcendentals=B * C,
        bytes_accessed=2 * B * C * HW * itemsize + weight_bytes + 8 * B,
    )

    kernel = functools.partial(af_kernel, use_mxu=use_mxu)

    out3 = pl.pallas_call(
        kernel,
        out_shape=jax.ShapeDtypeStruct((B, C, HW), x.dtype),
        grid_spec=pltpu.PrefetchScalarGridSpec(
            num_scalar_prefetch=0,
            grid=(grid,),
            in_specs=[
                _block_spec((bt, C, HW), lambda b: (b, 0, 0),
                            buffers=in_bufs if in_bufs != 2 else None),   # x batch tile
                pl.BlockSpec((b_pad, 1), lambda b: (0, 0)),               # snr (full, padded)
                pl.BlockSpec(w1_main.shape, lambda b: (0, 0)),            # dense1 W (channels)
                pl.BlockSpec((1, hidden), lambda b: (0, 0)),              # dense1 W (snr col)
                pl.BlockSpec((1, hidden), lambda b: (0, 0)),              # dense1 bias
                pl.BlockSpec((hidden, C), lambda b: (0, 0)),              # dense2 W^T
                pl.BlockSpec((1, C), lambda b: (0, 0)),                   # dense2 bias
            ],
            out_specs=_block_spec((bt, C, HW), lambda b: (b, 0, 0),
                                  buffers=out_bufs if out_bufs != 2 else None),
        ),
        compiler_params=pltpu.CompilerParams(
            dimension_semantics=("parallel",),
            vmem_limit_bytes=vmem_limit,
        ),
        cost_estimate=cost,
    )(x3, snr_pad, w1_main, w1_s, b1_r, w2_t, b2_r)

    return out3.reshape(B, C, H, W)


def af_module_ref(x, snr, w1, b1, w2, b2):
    # Pure-JAX reference mirroring the PyTorch forward.
    pooled = jnp.mean(x, axis=(2, 3))                     # (B, C)
    cat = jnp.concatenate([pooled, snr], axis=1)          # (B, C+1)
    h = jnp.maximum(cat @ w1.T + b1, 0.0)                 # (B, hidden)
    g = jax.nn.sigmoid(h @ w2.T + b2)                     # (B, C)
    return x * g[:, :, None, None]


def _run_case(key, B, C, H, W, tol):
    hidden = C // 16
    k_x, k_snr, k_w1, k_b1, k_w2, k_b2 = jax.random.split(key, 6)
    x = jax.random.normal(k_x, (B, C, H, W), dtype=jnp.float32)
    snr = jax.random.uniform(k_snr, (B, 1), dtype=jnp.float32, minval=0.0, maxval=20.0)
    w1 = 0.1 * jax.random.normal(k_w1, (hidden, C + 1), dtype=jnp.float32)
    b1 = 0.1 * jax.random.normal(k_b1, (hidden,), dtype=jnp.float32)
    w2 = 0.1 * jax.random.normal(k_w2, (C, hidden), dtype=jnp.float32)
    b2 = 0.1 * jax.random.normal(k_b2, (C,), dtype=jnp.float32)

    out = jax.block_until_ready(af_module(x, snr, w1, b1, w2, b2))
    ref = af_module_ref(x, snr, w1, b1, w2, b2)
    assert out.shape == (B, C, H, W)
    # out - ref = x * (gate - gate_ref): bound the gate error directly.
    gate_err = float(jnp.max(jnp.abs(out - ref) / (jnp.abs(x) + 1e-6)))
    assert gate_err < tol, ("mismatch", (B, C, H, W), gate_err)


if __name__ == "__main__":
    root = jax.random.PRNGKey(0)
    k_a, k_b, k_c = jax.random.split(root, 3)
    # Unrolled (hidden=2) VPU path, single grid step.
    _run_case(k_a, B=4, C=32, H=16, W=16, tol=1e-4)
    # MXU (hidden=8) path, cdiv grid with a partial trailing batch block + snr padding.
    _run_case(k_b, B=12, C=128, H=16, W=16, tol=5e-3)
    # MXU path, 8 grid steps of ~1 MiB blocks, deeper (Buffered(3)) input pipeline.
    _run_case(k_c, B=16, C=128, H=32, W=32, tol=5e-3)
    print("KERNEL_OK")
</pallas_src>

<mosaic_0001>
module attributes {stable_mosaic.version = 11 : i64} {
  func.func @af_kernel(%arg0: i32, %arg1: memref<4x32x256xf32, #tpu.memory_space<vmem>>, %arg2: memref<4x1xf32, #tpu.memory_space<vmem>>, %arg3: memref<2x32xf32, #tpu.memory_space<vmem>>, %arg4: memref<1x2xf32, #tpu.memory_space<vmem>>, %arg5: memref<1x2xf32, #tpu.memory_space<vmem>>, %arg6: memref<2x32xf32, #tpu.memory_space<vmem>>, %arg7: memref<1x32xf32, #tpu.memory_space<vmem>>, %arg8: memref<4x32x256xf32, #tpu.memory_space<vmem>>) attributes {dimension_semantics = [#tpu.dimension_semantics<parallel>], iteration_bounds = array<i64: 1>, scalar_prefetch = 0 : i64, scratch_operands = 0 : i64, tpu.core_type = #tpu.core_type<tc>, window_params = [{transform_indices = @transform_0, window_bounds = array<i64: 4, 32, 256>}, {pipeline_mode = #tpu.pipeline_mode<synchronous>, transform_indices = @transform_1, window_bounds = array<i64: 4, 1>}, {pipeline_mode = #tpu.pipeline_mode<synchronous>, transform_indices = @transform_2, window_bounds = array<i64: 2, 32>}, {pipeline_mode = #tpu.pipeline_mode<synchronous>, transform_indices = @transform_3, window_bounds = array<i64: 1, 2>}, {pipeline_mode = #tpu.pipeline_mode<synchronous>, transform_indices = @transform_4, window_bounds = array<i64: 1, 2>}, {pipeline_mode = #tpu.pipeline_mode<synchronous>, transform_indices = @transform_5, window_bounds = array<i64: 2, 32>}, {pipeline_mode = #tpu.pipeline_mode<synchronous>, transform_indices = @transform_6, window_bounds = array<i64: 1, 32>}, {transform_indices = @transform_7, window_bounds = array<i64: 4, 32, 256>}]} {
    %c0 = arith.constant 0 : index
    %c0_0 = arith.constant 0 : index
    %c0_1 = arith.constant 0 : index
    %0 = vector.load %arg1[%c0, %c0_0, %c0_1] : memref<4x32x256xf32, #tpu.memory_space<vmem>>, vector<4x32x256xf32>
    %cst = arith.constant dense<0.000000e+00> : vector<4x32xf32>
    %1 = vector.multi_reduction <add>, %0, %cst [2] : vector<4x32x256xf32> to vector<4x32xf32>
    %cst_2 = arith.constant 2.560000e+02 : f32
    %2 = vector.broadcast %cst_2 : f32 to vector<4x32xf32>
    %3 = arith.divf %1, %2 : vector<4x32xf32>
    %c4_i32 = arith.constant 4 : i32
    %4 = arith.muli %arg0, %c4_i32 : i32
    %5 = tpu.assume_multiple %4, 4 : i32
    %6 = arith.index_cast %5 : i32 to index
    %c0_3 = arith.constant 0 : index
    %7 = vector.load %arg2[%6, %c0_3] : memref<4x1xf32, #tpu.memory_space<vmem>>, vector<4x1xf32>
    %c0_4 = arith.constant 0 : index
    %c0_5 = arith.constant 0 : index
    %8 = vector.load %arg4[%c0_4, %c0_5] : memref<1x2xf32, #tpu.memory_space<vmem>>, vector<1x2xf32>
    %c0_6 = arith.constant 0 : index
    %c0_7 = arith.constant 0 : index
    %9 = vector.load %arg5[%c0_6, %c0_7] : memref<1x2xf32, #tpu.memory_space<vmem>>, vector<1x2xf32>
    %c0_8 = arith.constant 0 : index
    %c0_9 = arith.constant 0 : index
    %10 = vector.load %arg7[%c0_8, %c0_9] : memref<1x32xf32, #tpu.memory_space<vmem>>, vector<1x32xf32>
    %11 = vector.shape_cast %10 : vector<1x32xf32> to vector<1x32xf32>
    %12 = vector.broadcast %11 : vector<1x32xf32> to vector<4x32xf32>
    %c0_10 = arith.constant 0 : index
    %c0_11 = arith.constant 0 : index
    %13 = vector.load %arg3[%c0_10, %c0_11] : memref<2x32xf32, #tpu.memory_space<vmem>>, vector<1x32xf32>
    %14 = vector.broadcast %13 : vector<1x32xf32> to vector<4x32xf32>
    %15 = arith.mulf %3, %14 : vector<4x32xf32>
    %cst_12 = arith.constant dense<0.000000e+00> : vector<4xf32>
    %16 = vector.multi_reduction <add>, %15, %cst_12 [1] : vector<4x32xf32> to vector<4xf32>
    %17 = vector.shape_cast %16 : vector<4xf32> to vector<4x1xf32>
    %18 = vector.extract_strided_slice %8 {offsets = [0, 0], sizes = [1, 1], strides = [1, 1]} : vector<1x2xf32> to vector<1x1xf32>
    %19 = vector.broadcast %18 : vector<1x1xf32> to vector<4x1xf32>
    %20 = arith.mulf %7, %19 : vector<4x1xf32>
    %21 = arith.addf %17, %20 : vector<4x1xf32>
    %22 = vector.extract_strided_slice %9 {offsets = [0, 0], sizes = [1, 1], strides = [1, 1]} : vector<1x2xf32> to vector<1x1xf32>
    %23 = vector.broadcast %22 : vector<1x1xf32> to vector<4x1xf32>
    %24 = arith.addf %21, %23 : vector<4x1xf32>
    %cst_13 = arith.constant 0.000000e+00 : f32
    %25 = vector.broadcast %cst_13 : f32 to vector<4x1xf32>
    %26 = arith.maximumf %24, %25 : vector<4x1xf32>
    %c0_14 = arith.constant 0 : index
    %c0_15 = arith.constant 0 : index
    %27 = vector.load %arg6[%c0_14, %c0_15] : memref<2x32xf32, #tpu.memory_space<vmem>>, vector<1x32xf32>
    %28 = vector.broadcast %26 : vector<4x1xf32> to vector<4x32xf32>
    %29 = vector.broadcast %27 : vector<1x32xf32> to vector<4x32xf32>
    %30 = arith.mulf %28, %29 : vector<4x32xf32>
    %31 = arith.addf %12, %30 : vector<4x32xf32>
    %c1 = arith.constant 1 : index
    %c0_16 = arith.constant 0 : index
    %32 = vector.load %arg3[%c1, %c0_16] : memref<2x32xf32, #tpu.memory_space<vmem>>, vector<1x32xf32>
    %33 = vector.broadcast %32 : vector<1x32xf32> to vector<4x32xf32>
    %34 = arith.mulf %3, %33 : vector<4x32xf32>
    %cst_17 = arith.constant dense<0.000000e+00> : vector<4xf32>
    %35 = vector.multi_reduction <add>, %34, %cst_17 [1] : vector<4x32xf32> to vector<4xf32>
    %36 = vector.shape_cast %35 : vector<4xf32> to vector<4x1xf32>
    %37 = vector.extract_strided_slice %8 {offsets = [0, 1], sizes = [1, 1], strides = [1, 1]} : vector<1x2xf32> to vector<1x1xf32>
    %38 = vector.broadcast %37 : vector<1x1xf32> to vector<4x1xf32>
    %39 = arith.mulf %7, %38 : vector<4x1xf32>
    %40 = arith.addf %36, %39 : vector<4x1xf32>
    %41 = vector.extract_strided_slice %9 {offsets = [0, 1], sizes = [1, 1], strides = [1, 1]} : vector<1x2xf32> to vector<1x1xf32>
    %42 = vector.broadcast %41 : vector<1x1xf32> to vector<4x1xf32>
    %43 = arith.addf %40, %42 : vector<4x1xf32>
    %cst_18 = arith.constant 0.000000e+00 : f32
    %44 = vector.broadcast %cst_18 : f32 to vector<4x1xf32>
    %45 = arith.maximumf %43, %44 : vector<4x1xf32>
    %c1_19 = arith.constant 1 : index
    %c0_20 = arith.constant 0 : index
    %46 = vector.load %arg6[%c1_19, %c0_20] : memref<2x32xf32, #tpu.memory_space<vmem>>, vector<1x32xf32>
    %47 = vector.broadcast %45 : vector<4x1xf32> to vector<4x32xf32>
    %48 = vector.broadcast %46 : vector<1x32xf32> to vector<4x32xf32>
    %49 = arith.mulf %47, %48 : vector<4x32xf32>
    %50 = arith.addf %31, %49 : vector<4x32xf32>
    %51 = arith.negf %50 : vector<4x32xf32>
    %52 = math.exp %51 : vector<4x32xf32>
    %cst_21 = arith.constant 1.000000e+00 : f32
    %53 = vector.broadcast %cst_21 : f32 to vector<4x32xf32>
    %54 = arith.addf %53, %52 : vector<4x32xf32>
    %55 = arith.divf %53, %54 : vector<4x32xf32>
    %c0_22 = arith.constant 0 : index
    %c0_23 = arith.constant 0 : index
    %c0_24 = arith.constant 0 : index
    %56 = vector.load %arg1[%c0_22, %c0_23, %c0_24] : memref<4x32x256xf32, #tpu.memory_space<vmem>>, vector<4x32x256xf32>
    %57 = vector.shape_cast %55 : vector<4x32xf32> to vector<4x32x1xf32>
    %58 = vector.broadcast %57 : vector<4x32x1xf32> to vector<4x32x256xf32>
    %59 = arith.mulf %56, %58 : vector<4x32x256xf32>
    %c0_25 = arith.constant 0 : index
    %c0_26 = arith.constant 0 : index
    %c0_27 = arith.constant 0 : index
    %60 = vector.load %arg8[%c0_25, %c0_26, %c0_27] : memref<4x32x256xf32, #tpu.memory_space<vmem>>, vector<4x32x256xf32>
    tpu.vector_store %arg8[%c0_25, %c0_26, %c0_27], %59 {strides = array<i32>} : memref<4x32x256xf32, #tpu.memory_space<vmem>>, vector<4x32x256xf32>,
    return
  }
  func.func @transform_0(%arg0: i32) -> (i32, i32, i32) {
    %c0_i32 = arith.constant 0 : i32
    %c0_i32_0 = arith.constant 0 : i32
    %c0_i32_1 = arith.constant 0 : i32
    return %arg0, %c0_i32, %c0_i32_0 : i32, i32, i32
  }
  func.func @transform_1(%arg0: i32) -> (i32, i32) {
    %c0_i32 = arith.constant 0 : i32
    %c0_i32_0 = arith.constant 0 : i32
    %c0_i32_1 = arith.constant 0 : i32
    return %c0_i32, %c0_i32_0 : i32, i32
  }
  func.func @transform_2(%arg0: i32) -> (i32, i32) {
    %c0_i32 = arith.constant 0 : i32
    %c0_i32_0 = arith.constant 0 : i32
    %c0_i32_1 = arith.constant 0 : i32
    return %c0_i32, %c0_i32_0 : i32, i32
  }
  func.func @transform_3(%arg0: i32) -> (i32, i32) {
    %c0_i32 = arith.constant 0 : i32
    %c0_i32_0 = arith.constant 0 : i32
    %c0_i32_1 = arith.constant 0 : i32
    return %c0_i32, %c0_i32_0 : i32, i32
  }
  func.func @transform_4(%arg0: i32) -> (i32, i32) {
    %c0_i32 = arith.constant 0 : i32
    %c0_i32_0 = arith.constant 0 : i32
    %c0_i32_1 = arith.constant 0 : i32
    return %c0_i32, %c0_i32_0 : i32, i32
  }
  func.func @transform_5(%arg0: i32) -> (i32, i32) {
    %c0_i32 = arith.constant 0 : i32
    %c0_i32_0 = arith.constant 0 : i32
    %c0_i32_1 = arith.constant 0 : i32
    return %c0_i32, %c0_i32_0 : i32, i32
  }
  func.func @transform_6(%arg0: i32) -> (i32, i32) {
    %c0_i32 = arith.constant 0 : i32
    %c0_i32_0 = arith.constant 0 : i32
    %c0_i32_1 = arith.constant 0 : i32
    return %c0_i32, %c0_i32_0 : i32, i32
  }
  func.func @transform_7(%arg0: i32) -> (i32, i32, i32) {
    %c0_i32 = arith.constant 0 : i32
    %c0_i32_0 = arith.constant 0 : i32
    %c0_i32_1 = arith.constant 0 : i32
    return %arg0, %c0_i32, %c0_i32_0 : i32, i32, i32
  }
}

</mosaic_0001>

<bundles_post_ra>
// kernel: tpu_custom_call.1
= control target key start
LH: loop header
LB: loop body
LE: loop exit
PB: predicated region body
PF: predicated region fallthrough
CT: control target
= control target key end

     0   :  { %12 = vsyncpa [#allocation3], 0  ;;  %s1125_s0 = inlined_call_operand.hbm [shape: f32[4,32,256], index: 0, kind: input, shape index: {}]   ;;  %s1126_s1 = inlined_call_operand.vmem [shape: f32[4,1], index: 1, kind: input, shape index: {}]   ;;  %s1127_s2 = inlined_call_operand.vmem [shape: f32[2,32], index: 2, kind: input, shape index: {}]   ;;  %s1128_s3 = inlined_call_operand.vmem [shape: f32[1,2], index: 3, kind: input, shape index: {}]   ;;  %s1129_s4 = inlined_call_operand.vmem [shape: f32[1,2], index: 4, kind: input, shape index: {}]   ;;  %s1130_s5 = inlined_call_operand.vmem [shape: f32[2,32], index: 5, kind: input, shape index: {}]   ;;  %s1131_s6 = inlined_call_operand.vmem [shape: f32[1,32], index: 6, kind: input, shape index: {}]   ;;  %s1132_s7 = inlined_call_operand.hbm [shape: f32[4,32,256], index: 7, kind: output, shape index: {}]  }
   0x1   :  { %13 = vsyncpa [#allocation4], 0  ;;  %s815_s24 = smov [#allocation2]  }
   0x2   :  { %s19_s25 = sshll.u32 %s815_s24, 4  ;;  %s20_s25 = int_to_ptr.vmem [resolvable:$true] %s19_s25 }
   0x3   :  { %s779_s26 = scalar_lea.vmem %s20_s25, 4096  ;;  %p784_p1 = scmp.lt.s32.totalorder %s20_s25, %s20_s25 }
   0x4   :  { %p780_p0 = scmp.ne.s32.totalorder %s20_s25, %s779_s26  ;;  %p785_p2 = scmp.lt.s32.totalorder %s779_s26, %s779_s26 }
   0x6   :  { %p786_p3 = por %p785_p2, %p784_p1 }
   0x8   :  { %p787_p4 = pnand %p786_p3, %p780_p0 }
   0xa   :  { %790 = shalt.err (!%p787_p4)
}
   0xb   :  { %s816_s27 = smov 256   ;;  %s817_s28 = smov 16  }
   0xc   :  { %25 = dma.hbm_to_vmem [thread:$0]  %s1125_s0, 4096, %s20_s25, [#allocation3], %s816_s27, %s816_s27, %s817_s28  }
   0xd   :  { %811 = dma.done.wait [#allocation3], 4096  }
   0xe   :  { %812 = vsyncadd [#allocation3], 4294963200  ;;  %v867_v0 = vld [vmem:[#allocation2 + $0x40] sm:$0xff]  ;;  %v869_v1 = vld [vmem:[#allocation2 + $0x48] sm:$0xff]  ;;  %v818_v49 = vmov 0   ;;  %vm266_vm0 = vcmask 130112  }
   0xf   :  { %v871_v2 = vld [vmem:[#allocation2] sm:$0xff]  ;;  %v85_v3 = vadd.f32 %v869_v1, %v867_v0  ;;  %v875_v4 = vld [vmem:[#allocation2 + $0x8] sm:$0xff]  ;;  %v877_v5 = vld [vmem:[#allocation2 + $0x50] sm:$0xff]  ;;  %766 = vset.pattern.permute.xlu1 %v818_v49  ;;  %765 = vset.pattern.permute.xlu0 %v818_v49  ;;  %vm273_vm1 = vcmask 195712   ;;  %vm280_vm2 = vcmask 261312   ;;  %vm339_vm3 = vcmask 1041409  }
  0x10   :  { %v879_v6 = vld [vmem:[#allocation2 + $0x58] sm:$0xff]  ;;  %v73_v7 = vadd.f32 %v875_v4, %v871_v2  ;;  %v883_v8 = vld [vmem:[#allocation2 + $0x10] sm:$0xff]  ;;  %v891_v12 = vld [vmem:[#allocation2 + $0x60] sm:$0xff]  ;;  %vm341_vm4 = vcmask 1042434   ;;  %vm343_vm5 = vcmask 1043459   ;;  %vm346_vm6 = vcmask 257024  }
  0x11   :  { %v885_v9 = vld [vmem:[#allocation2 + $0x18] sm:$0xff]  ;;  %86 = vadd.xlane.f32.xlu1 %v85_v3  ;;  %v88_v10 = vadd.f32 %v879_v6, %v877_v5  ;;  %v893_v13 = vld [vmem:[#allocation2 + $0x68] sm:$0xff]  ;;  %v895_v14 = vld [vmem:[#allocation2 + $0x20] sm:$0xff]  ;;  %s819_s12 = smov 127  }
  0x12   :  { %74 = vadd.xlane.f32.xlu0 %v73_v7  ;;  %v76_v11 = vadd.f32 %v885_v9, %v883_v8  ;;  %v897_v15 = vld [vmem:[#allocation2 + $0x28] sm:$0xff]  ;;  %v91_v16 = vadd.f32 %v893_v13, %v891_v12  ;;  %v903_v18 = vld [vmem:[#allocation2 + $0x90] sm:$0xff]  ;;  %v905_v19 = vld [vmem:[#allocation2 + $0x98] sm:$0xff] }
  0x13   :  { %v79_v17 = vadd.f32 %v897_v15, %v895_v14  ;;  %v907_v20 = vld [vmem:[#allocation2 + $0x80] sm:$0xff]  ;;  %v909_v21 = vld [vmem:[#allocation2 + $0x88] sm:$0xff]  ;;  %v100_v22 = vadd.f32 %v905_v19, %v903_v18  ;;  %v915_v24 = vld [vmem:[#allocation2 + $0x70] sm:$0xff] }
  0x14   :  { %v97_v23 = vadd.f32 %v909_v21, %v907_v20  ;;  %v917_v25 = vld [vmem:[#allocation2 + $0x78] sm:$0xff]  ;;  %v919_v26 = vld [vmem:[#allocation2 + $0x30] sm:$0xff]  ;;  %v927_v30 = vld [vmem:[#allocation2 + $0xc0] sm:$0xff] }
  0x15   :  { %89 = vadd.xlane.f32.xlu1 %v88_v10  ;;  %v921_v27 = vld [vmem:[#allocation2 + $0x38] sm:$0xff]  ;;  %v94_v28 = vadd.f32 %v917_v25, %v915_v24  ;;  %v929_v31 = vld [vmem:[#allocation2 + $0xc8] sm:$0xff]  ;;  %v931_v32 = vld [vmem:[#allocation2 + $0xa0] sm:$0xff] }
  0x16   :  { %77 = vadd.xlane.f32.xlu0 %v76_v11  ;;  %v82_v29 = vadd.f32 %v921_v27, %v919_v26  ;;  %1138 = vst [vmem:[#allocation8_spill] sm:$0xff] %v929_v31  ;;  %v933_v33 = vld [vmem:[#allocation2 + $0xa8] sm:$0xff]  ;;  %v109_v34 = vadd.f32 %v929_v31, %v927_v30  ;;  %v939_v36 = vld [vmem:[#allocation2 + $0xb0] sm:$0xff]  ;;  %v941_v37 = vld [vmem:[#allocation2 + $0xb8] sm:$0xff] }
  0x17   :  { %v103_v35 = vadd.f32 %v933_v33, %v931_v32  ;;  %v943_v38 = vld [vmem:[#allocation2 + $0xd0] sm:$0xff]  ;;  %v945_v39 = vld [vmem:[#allocation2 + $0xd8] sm:$0xff]  ;;  %v106_v40 = vadd.f32 %v941_v37, %v939_v36  ;;  %v955_v44 = vld [vmem:[#allocation2 + $0xe0] sm:$0xff] }
  0x18   :  { %v112_v41 = vadd.f32 %v945_v39, %v943_v38  ;;  %v951_v42 = vld [vmem:[#allocation2 + $0xf0] sm:$0xff]  ;;  %v953_v43 = vld [vmem:[#allocation2 + $0xf8] sm:$0xff]  ;;  %1141 = vst [vmem:[#allocation11_spill] sm:$0xff] %v955_v44  ;;  %v957_v45 = vld [vmem:[#allocation2 + $0xe8] sm:$0xff] }
  0x19   :  { %92 = vadd.xlane.f32.xlu1 %v91_v16  ;;  %1139 = vst [vmem:[#allocation9_spill] sm:$0xff] %v951_v42  ;;  %1140 = vst [vmem:[#allocation10_spill] sm:$0xff] %v953_v43  ;;  %v118_v46 = vadd.f32 %v953_v43, %v951_v42  ;;  %v115_v47 = vadd.f32 %v957_v45, %v955_v44  ;;  %v752_v48 = vld [vmem:[%s1127_s2] ss:$0 sm:$0xff]  ;;  %v756_v50 = vld [vmem:[%s1127_s2 + $0x1] ss:$0 sm:$0xff] }
  0x1a   :  { %80 = vadd.xlane.f32.xlu0 %v79_v17  ;;  %1142 = vst [vmem:[#allocation12_spill] sm:$0xff] %v957_v45 }
  0x1d   :  { %101 = vadd.xlane.f32.xlu1 %v100_v22 }
  0x1e   :  { %98 = vadd.xlane.f32.xlu0 %v97_v23 }
  0x21   :  { %95 = vadd.xlane.f32.xlu1 %v94_v28 }
  0x22   :  { %83 = vadd.xlane.f32.xlu0 %v82_v29 }
  0x25   :  { %110 = vadd.xlane.f32.xlu1 %v109_v34 }
  0x26   :  { %104 = vadd.xlane.f32.xlu0 %v103_v35 }
  0x29   :  { %107 = vadd.xlane.f32.xlu1 %v106_v40 }
  0x2a   :  { %113 = vadd.xlane.f32.xlu0 %v112_v41 }
  0x2d   :  { %119 = vadd.xlane.f32.xlu1 %v118_v46 }
  0x2e   :  { %116 = vadd.xlane.f32.xlu0 %v115_v47 }
  0x3e   :  { %161 = vbcast.lane.b32.xlu1 %v752_v48, 264 }
  0x42   :  { %165 = vbcast.lane.b32.xlu1 %v752_v48, 272 }
  0x44   :  { %157 = vbcast.lane.b32.xlu0 %v752_v48, 256 }
  0x46   :  { %169 = vbcast.lane.b32.xlu1 %v752_v48, 280 }
  0x48   :  { %385 = vbcast.lane.b32.xlu0 %v756_v50, 256 }
  0x4a   :  { %389 = vbcast.lane.b32.xlu1 %v756_v50, 264 }
  0x4c   :  { %393 = vbcast.lane.b32.xlu0 %v756_v50, 272 }
  0x4e   :  { %397 = vbcast.lane.b32.xlu1 %v756_v50, 280 }
  0x9a   :  { %v87_v51 = vpop.xlane.xlu1 %86 }
  0x9b   :  { %v75_v52 = vpop.xlane.xlu0 %74  ;;  %v126_v29 = vmul.f32 0.00390625, %v87_v51 }
  0x9c   :  { %v122_v16 = vmul.f32 0.00390625, %v75_v52 }
  0x9e   :  { %v90_v53 = vpop.xlane.xlu1 %89 }
  0x9f   :  { %v78_v54 = vpop.xlane.xlu0 %77  ;;  %v127_v34 = vmul.f32 0.00390625, %v90_v53 }
  0xa0   :  { %v123_v11 = vmul.f32 0.00390625, %v78_v54 }
  0xa2   :  { %v93_v55 = vpop.xlane.xlu1 %92 }
  0xa3   :  { %v81_v56 = vpop.xlane.xlu0 %80  ;;  %v128_v47 = vmul.f32 0.00390625, %v93_v55 }
  0xa4   :  { %v124_v46 = vmul.f32 0.00390625, %v81_v56 }
  0xa6   :  { %v102_v57 = vpop.xlane.xlu1 %101 }
  0xa7   :  { %v99_v58 = vpop.xlane.xlu0 %98  ;;  %v131_v52 = vmul.f32 0.00390625, %v102_v57 }
  0xa8   :  { %v130_v50 = vmul.f32 0.00390625, %v99_v58 }
  0xaa   :  { %v96_v59 = vpop.xlane.xlu1 %95 }
  0xab   :  { %v84_v60 = vpop.xlane.xlu0 %83  ;;  %v129_v53 = vmul.f32 0.00390625, %v96_v59 }
  0xac   :  { %v125_v51 = vmul.f32 0.00390625, %v84_v60 }
  0xae   :  { %v111_v61 = vpop.xlane.xlu1 %110 }
  0xaf   :  { %v105_v62 = vpop.xlane.xlu0 %104  ;;  %v134_v56 = vmul.f32 0.00390625, %v111_v61 }
  0xb0   :  { %v132_v43 = vmul.f32 0.00390625, %v105_v62 }
  0xb2   :  { %v108_v63 = vpop.xlane.xlu1 %107 }
  0xb3   :  { %v114_v3 = vpop.xlane.xlu0 %113 }
  0xb6   :  { %v969_v7 = vpop.xlane.xlu1 %119 }
  0xb7   :  { %v117_v10 = vpop.xlane.xlu0 %116 }
  0xb8   :  { %v136_v61 = vmul.f32 0.00390625, %v117_v10 }
  0xba   :  { %v162_v17 = vpop.permute.xlu1 %161 }
  0xbb   :  { %v158_v22 = vpop.permute.xlu0 %157  ;;  %v176_v23 = vmul.f32 %v162_v17, %v123_v11  ;;  %v180_v41 = vmul.f32 %v162_v17, %v127_v34  ;;  %v184_v44 = vmul.f32 %v162_v17, %v131_v52 }
  0xbc   :  { %v175_v28 = vmul.f32 %v158_v22, %v122_v16  ;;  %v179_v35 = vmul.f32 %v158_v22, %v126_v29  ;;  %v183_v54 = vmul.f32 %v158_v22, %v130_v50 }
  0xbd   :  { %211 = vperm.xlu1 %766, %v176_v23  }
  0xbe   :  { %208 = vperm.xlu0 %765, %v175_v28   ;;  %v166_v40 = vpop.permute.xlu1 %165 }
  0xbf   :  { %v177_v48 = vmul.f32 %v166_v40, %v124_v46  ;;  %v181_v49 = vmul.f32 %v166_v40, %v128_v47  ;;  %v185_v55 = vmul.f32 %v166_v40, %v132_v43  ;;  %v386_v58 = vpop.permute.xlu0 %385 }
  0xc0   :  { %v407_v59 = vmul.f32 %v386_v58, %v126_v29 }
  0xc1   :  { %220 = vperm.xlu1 %766, %v179_v35   ;;  %v187_v35 = vmul.f32 %v158_v22, %v134_v56 }
  0xc2   :  { %223 = vperm.xlu0 %765, %v180_v41   ;;  %v170_v45 = vpop.permute.xlu1 %169  ;;  %v135_v41 = vmul.f32 0.00390625, %v114_v3  ;;  %v189_v3 = vmul.f32 %v166_v40, %v136_v61  ;;  %v415_v40 = vmul.f32 %v386_v58, %v134_v56 }
  0xc3   :  { %v178_v23 = vmul.f32 %v170_v45, %v125_v51  ;;  %v182_v28 = vmul.f32 %v170_v45, %v129_v53 }
  0xc4   :  { %v188_v57 = vmul.f32 %v162_v17, %v135_v41 }
  0xc5   :  { %214 = vperm.xlu1 %766, %v177_v48  }
  0xc6   :  { %226 = vperm.xlu0 %765, %v181_v49   ;;  %v390_v48 = vpop.permute.xlu1 %389  ;;  %v403_v49 = vmul.f32 %v386_v58, %v122_v16  ;;  %v137_v16 = vmul.f32 0.00390625, %v969_v7 }
  0xc7   :  { %v404_v60 = vmul.f32 %v390_v48, %v123_v11  ;;  %v408_v62 = vmul.f32 %v390_v48, %v127_v34  ;;  %v412_v11 = vmul.f32 %v390_v48, %v131_v52 }
  0xc9   :  { %232 = vperm.xlu1 %766, %v183_v54  }
  0xca   :  { %235 = vperm.xlu0 %765, %v184_v44   ;;  %v133_v44 = vmul.f32 0.00390625, %v108_v63  ;;  %v398_v29 = vpop.permute.xlu1 %397  ;;  %v190_v63 = vmul.f32 %v170_v45, %v137_v16 }
  0xcb   :  { %v406_v34 = vmul.f32 %v398_v29, %v125_v51  ;;  %v410_v10 = vmul.f32 %v398_v29, %v129_v53  ;;  %v418_v7 = vmul.f32 %v398_v29, %v137_v16 }
  0xcc   :  { %v186_v54 = vmul.f32 %v170_v45, %v133_v44 }
  0xcd   :  { %217 = vperm.xlu1 %766, %v178_v23   ;;  %v394_v23 = vpop.permute.xlu0 %393 }
  0xce   :  { %229 = vperm.xlu0 %765, %v182_v28   ;;  %v405_v22 = vmul.f32 %v394_v23, %v124_v46  ;;  %v409_v17 = vmul.f32 %v394_v23, %v128_v47  ;;  %v411_v28 = vmul.f32 %v386_v58, %v130_v50  ;;  %v416_v46 = vmul.f32 %v390_v48, %v135_v41 }
  0xcf   :  { %v414_v47 = vmul.f32 %v398_v29, %v133_v44  ;;  %v417_v50 = vmul.f32 %v394_v23, %v136_v61  ;;  %v255_v41 = vlaneseq }
  0xd1   :  { %238 = vperm.xlu1 %766, %v185_v55   ;;  %v413_v55 = vmul.f32 %v394_v23, %v132_v43  ;;  %v978_v23 = vshrl.u32 %v255_v41, 7 }
  0xd2   :  { %244 = vperm.xlu0 %765, %v187_v35  }
  0xd5   :  { %247 = vperm.xlu1 %766, %v188_v57  }
  0xd6   :  { %436 = vperm.xlu0 %765, %v403_v49  }
  0xd9   :  { %439 = vperm.xlu1 %766, %v404_v60  }
  0xda   :  { %448 = vperm.xlu0 %765, %v407_v59  }
  0xdd   :  { %451 = vperm.xlu1 %766, %v408_v62   ;;  %v256_v62 = vand.u32 127, %v255_v41 }
  0xde   :  { %241 = vperm.xlu0 %765, %v186_v54  }
  0xdf   :  { %v986_v29 = vsub.s32 %v256_v62, %v978_v23 }
  0xe1   :  { %250 = vperm.xlu1 %766, %v189_v3   ;;  %v261_v3 = vadd.s32 4294967288, %v256_v62 }
  0xe2   :  { %442 = vperm.xlu0 %765, %v405_v22   ;;  %v268_v22 = vadd.s32 4294967280, %v256_v62 }
  0xe5   :  { %454 = vperm.xlu1 %766, %v409_v17   ;;  %v275_v17 = vadd.s32 4294967272, %v256_v62 }
  0xe6   :  { %460 = vperm.xlu0 %765, %v411_v28  }
  0xe9   :  { %463 = vperm.xlu1 %766, %v412_v11   ;;  %v983_v11 = vsub.s32 %v261_v3, %v978_v23 }
  0xea   :  { %253 = vperm.xlu0 %765, %v190_v63   ;;  %v989_v63 = vsub.s32 %v268_v22, %v978_v23 }
  0xed   :  { %445 = vperm.xlu1 %766, %v406_v34   ;;  %v992_v34 = vsub.s32 %v275_v17, %v978_v23 }
  0xee   :  { %457 = vperm.xlu0 %765, %v410_v10  }
  0xf1   :  { %466 = vperm.xlu1 %766, %v413_v55  }
  0xf2   :  { %472 = vperm.xlu0 %765, %v415_v40  }
  0xf5   :  { %475 = vperm.xlu1 %766, %v416_v46  }
  0xf6   :  { %469 = vperm.xlu0 %765, %v414_v47  }
  0xf9   :  { %478 = vperm.xlu1 %766, %v417_v50  }
  0xfa   :  { %481 = vperm.xlu0 %765, %v418_v7  }
 0x138   :  { %v212_v52 = vpop.permute.xlu1 %211 }
 0x139   :  { %v209_v45 = vpop.permute.xlu0 %208  ;;  %v265_v40 = vrot.slane %v212_v52, %v983_v11 }
 0x13a   :  { %v260_v46 = vrot.slane %v209_v45, %v986_v29 }
 0x13c   :  { %v221_v35 = vpop.permute.xlu1 %220 }
 0x13d   :  { %v224_v57 = vpop.permute.xlu0 %223  ;;  %v285_v47 = vrot.slane %v221_v35, %v986_v29 }
 0x13e   :  { %v289_v50 = vrot.slane %v224_v57, %v983_v11 }
 0x140   :  { %v215_v51 = vpop.permute.xlu1 %214 }
 0x141   :  { %v227_v53 = vpop.permute.xlu0 %226  ;;  %v272_v7 = vrot.slane %v215_v51, %v989_v63  ;;  %v267_v51 = vsel %vm266_vm0, %v265_v40, %v260_v46 }
 0x142   :  { %v294_v41 = vrot.slane %v227_v53, %v989_v63  ;;  %v290_v53 = vsel %vm266_vm0, %v289_v50, %v285_v47 }
 0x144   :  { %v233_v49 = vpop.permute.xlu1 %232 }
 0x145   :  { %v236_v60 = vpop.permute.xlu0 %235  ;;  %v304_v62 = vrot.slane %v233_v49, %v986_v29 }
 0x146   :  { %v308_v3 = vrot.slane %v236_v60, %v983_v11  ;;  %v274_v60 = vsel %vm273_vm1, %v272_v7, %v267_v51 }
 0x148   :  { %v218_v43 = vpop.permute.xlu1 %217 }
 0x149   :  { %v230_v56 = vpop.permute.xlu0 %229  ;;  %v279_v22 = vrot.slane %v218_v43, %v992_v34  ;;  %v295_v43 = vsel %vm273_vm1, %v294_v41, %v290_v53 }
 0x14a   :  { %v299_v17 = vrot.slane %v230_v56, %v992_v34  ;;  %v309_v56 = vsel %vm266_vm0, %v308_v3, %v304_v62 }
 0x14b   :  { %v281_v42 = vsel %vm280_vm2, %v279_v22, %v274_v60 }
 0x14c   :  { %v239_v58 = vpop.permute.xlu1 %238 }
 0x14d   :  { %v245_v59 = vpop.permute.xlu0 %244  ;;  %v313_v52 = vrot.slane %v239_v58, %v989_v63 }
 0x14e   :  { %v323_v40 = vrot.slane %v245_v59, %v986_v29 }
 0x14f   :  { %v314_v31 = vsel %vm273_vm1, %v313_v52, %v309_v56 }
 0x150   :  { %v248_v48 = vpop.permute.xlu1 %247 }
 0x151   :  { %v972_v44 = vpop.permute.xlu0 %436  ;;  %v327_v49 = vrot.slane %v248_v48, %v983_v11 }
 0x152   :  { %v486_v53 = vrot.slane %v972_v44, %v986_v29 }
 0x153   :  { %v328_v50 = vsel %vm266_vm0, %v327_v49, %v323_v40 }
 0x154   :  { %v974_v54 = vpop.permute.xlu1 %439 }
 0x155   :  { %v976_v61 = vpop.permute.xlu0 %448  ;;  %v490_v51 = vrot.slane %v974_v54, %v983_v11 }
 0x156   :  { %v505_v56 = vrot.slane %v976_v61, %v986_v29 }
 0x158   :  { %v980_v28 = vpop.permute.xlu1 %451 }
 0x159   :  { %v242_v16 = vpop.permute.xlu0 %241 }
 0x15a   :  { %v318_v35 = vrot.slane %v242_v16, %v992_v34  ;;  %v300_v16 = vsel %vm280_vm2, %v299_v17, %v295_v43 }
 0x15b   :  { %v340_v41 = vsel %vm339_vm3, %v300_v16, %v281_v42  ;;  %v509_v42 = vrot.slane %v980_v28, %v983_v11 }
 0x15c   :  { %v251_v10 = vpop.permute.xlu1 %250  ;;  %v319_v48 = vsel %vm280_vm2, %v318_v35, %v314_v31 }
 0x15d   :  { %v994_v55 = vpop.permute.xlu0 %442  ;;  %v332_v58 = vrot.slane %v251_v10, %v989_v63  ;;  %v342_v59 = vsel %vm341_vm4, %v319_v48, %v340_v41  ;;  %v491_v48 = vsel %vm266_vm0, %v490_v51, %v486_v53  ;;  %v140_v53 = vld [vmem:[%s1126_s1] sm:$0xf] }
 0x15e   :  { %v495_v49 = vrot.slane %v994_v55, %v989_v63  ;;  %v510_v55 = vsel %vm266_vm0, %v509_v42, %v505_v56 }
 0x15f   :  { %v333_v10 = vsel %vm273_vm1, %v332_v58, %v328_v50 }
 0x160   :  { %v455_v45 = vpop.permute.xlu1 %454  ;;  %v496_v61 = vsel %vm273_vm1, %v495_v49, %v491_v48 }
 0x161   :  { %v461_v57 = vpop.permute.xlu0 %460  ;;  %v514_v60 = vrot.slane %v455_v45, %v989_v63 }
 0x162   :  { %v524_v40 = vrot.slane %v461_v57, %v986_v29 }
 0x164   :  { %v464_v46 = vpop.permute.xlu1 %463 }
 0x165   :  { %v254_v47 = vpop.permute.xlu0 %253  ;;  %v528_v43 = vrot.slane %v464_v46, %v983_v11 }
 0x166   :  { %v337_v7 = vrot.slane %v254_v47, %v992_v34  ;;  %v515_v47 = vsel %vm273_vm1, %v514_v60, %v510_v55 }
 0x167   :  { %v529_v50 = vsel %vm266_vm0, %v528_v43, %v524_v40 }
 0x168   :  { %v446_v62 = vpop.permute.xlu1 %445  ;;  %v338_v3 = vsel %vm280_vm2, %v337_v7, %v333_v10 }
 0x169   :  { %v458_v22 = vpop.permute.xlu0 %457  ;;  %v344_v31 = vsel %vm343_vm5, %v338_v3, %v342_v59  ;;  %v500_v58 = vrot.slane %v446_v62, %v992_v34 }
 0x16a   :  { %v347_v17 = vsel %vm346_vm6, %v344_v31, 0.0  ;;  %v519_v54 = vrot.slane %v458_v22, %v992_v34 }
 0x16b   :  { %348 = vadd.xlane.f32.xlu1 %v347_v17  ;;  %v501_v7 = vsel %vm280_vm2, %v500_v58, %v496_v61 }
 0x16c   :  { %v467_v52 = vpop.permute.xlu1 %466  ;;  %v520_v10 = vsel %vm280_vm2, %v519_v54, %v515_v47  ;;  %v751_v47 = vld [vmem:[%s1131_s6] ss:$0 sm:$0xff] }
 0x16d   :  { %v473_v35 = vpop.permute.xlu0 %472  ;;  %v533_v16 = vrot.slane %v467_v52, %v989_v63  ;;  %v559_v52 = vsel %vm339_vm3, %v520_v10, %v501_v7 }
 0x16e   :  { %v543_v41 = vrot.slane %v473_v35, %v986_v29  ;;  %v754_v35 = vld [vmem:[%s1129_s4] ss:$0 sm:$0xff] }
 0x16f   :  { %v534_v57 = vsel %vm273_vm1, %v533_v16, %v529_v50  ;;  %v757_v50 = vld [vmem:[%s1130_s5 + $0x1] ss:$0 sm:$0xff] }
 0x170   :  { %v476_v28 = vpop.permute.xlu1 %475 }
 0x171   :  { %v470_v44 = vpop.permute.xlu0 %469  ;;  %v547_v45 = vrot.slane %v476_v28, %v983_v11 }
 0x172   :  { %v538_v46 = vrot.slane %v470_v44, %v992_v34 }
 0x173   :  { %v548_v22 = vsel %vm266_vm0, %v547_v45, %v543_v41  ;;  %v755_v45 = vld [vmem:[%s1130_s5] ss:$0 sm:$0xff]  ;;  %s820_s5 = smov [#allocation5]  }
 0x174   :  { %v479_v62 = vpop.permute.xlu1 %478  ;;  %v539_v3 = vsel %vm280_vm2, %v538_v46, %v534_v57  ;;  %s739_s6 = sshll.u32 %s820_s5, 4  ;;  %s740_s6 = int_to_ptr.vmem [resolvable:$true] %s739_s6 }
 0x175   :  { %v552_v11 = vrot.slane %v479_v62, %v989_v63  ;;  %v482_v59 = vpop.permute.xlu0 %481  ;;  %v560_v42 = vsel %vm341_vm4, %v539_v3, %v559_v52  ;;  %s791_s20 = scalar_lea.vmem %s740_s6, 4096  ;;  %p796_p6 = scmp.lt.s32.totalorder %s740_s6, %s740_s6 }
 0x176   :  { %v557_v31 = vrot.slane %v482_v59, %v992_v34  ;;  %v753_v34 = vld [vmem:[%s1128_s3] ss:$0 sm:$0xff]  ;;  %v596_v59 = vsub.s32 0, %v978_v23  ;;  %p792_p5 = scmp.ne.s32.totalorder %s740_s6, %s791_s20  ;;  %p797_p7 = scmp.lt.s32.totalorder %s791_s20, %s791_s20 }
 0x177   :  { %v553_v17 = vsel %vm273_vm1, %v552_v11, %v548_v22  ;;  %v356_v49 = vmul.f32 %v753_v34, %v140_v53 }
 0x178   :  { %v558_v51 = vsel %vm280_vm2, %v557_v31, %v553_v17  ;;  %v615_v17 = vsub.s32 1, %v978_v23  ;;  %p798_p8 = por %p797_p7, %p796_p6 }
 0x179   :  { %v561_v29 = vsel %vm343_vm5, %v558_v51, %v560_v42  ;;  %v634_v51 = vsub.s32 2, %v978_v23 }
 0x17a   :  { %v563_v63 = vsel %vm346_vm6, %v561_v29, 0.0  ;;  %v653_v29 = vsub.s32 3, %v978_v23  ;;  %p799_p9 = pnand %p798_p8, %p792_p5 }
 0x17b   :  { %564 = vadd.xlane.f32.xlu0 %v563_v63 }
 0x17c   :  { %571 = vrot.lane.b32.xlu1 %v754_v35, %s819_s12 }
 0x191   :  { %566 = vrot.lane.b32.xlu0 %v753_v34, %s819_s12 }
 0x1f4   :  { %v349_v60 = vpop.xlane.xlu1 %348 }
 0x1f5   :  { %v357_v43 = vadd.f32 %v356_v49, %v349_v60 }
 0x1f7   :  { %v364_v56 = vadd.f32 %v754_v35, %v357_v43 }
 0x1f8   :  { %v572_v40 = vpop.permute.xlu1 %571 }
 0x1f9   :  { %v365_v58 = vmax.f32 %v364_v56, 0.0 }
 0x1fb   :  { %369 = vperm.xlu1 %766, %v365_v58  }
 0x204   :  { %v565_v54 = vpop.xlane.xlu0 %564 }
 0x208   :  { %v567_v16 = vpop.permute.xlu0 %566 }
 0x209   :  { %v569_v28 = vmul.f32 %v567_v16, %v140_v53 }
 0x20b   :  { %v570_v44 = vadd.f32 %v569_v28, %v565_v54 }
 0x20d   :  { %v574_v48 = vadd.f32 %v572_v40, %v570_v44 }
 0x20f   :  { %v575_v55 = vmax.f32 %v574_v48, 0.0 }
 0x211   :  { %579 = vperm.xlu0 %765, %v575_v55  }
 0x276   :  { %v370_v46 = vpop.permute.xlu1 %369 }
 0x277   :  { %v376_v61 = vmul.f32 %v755_v45, %v370_v46 }
 0x279   :  { %v377_v10 = vadd.f32 %v751_v47, %v376_v61 }
 0x28c   :  { %v580_v7 = vpop.permute.xlu0 %579 }
 0x28d   :  { %v586_v57 = vmul.f32 %v757_v50, %v580_v7  ;;  %v1143_v7 = vld [vmem:[#allocation8_spill] sm:$0xff] }
 0x28f   :  { %v587_v41 = vadd.f32 %v586_v57, %v377_v10  ;;  %v1145_v57 = vld [vmem:[#allocation10_spill] sm:$0xff] }
 0x291   :  { %v758_v62 = vmul.f32 -1.442695, %v587_v41 }
 0x293   :  { %767 = vpow2.f32 %v758_v62  ;;  %v1146_v62 = vld [vmem:[#allocation11_spill] sm:$0xff] }
 0x2a0   :  { %v768_v3 = vpop.eup %767 }
 0x2a1   :  { %v591_v11 = vadd.f32 1.0, %v768_v3  ;;  %v1147_v3 = vld [vmem:[#allocation12_spill] sm:$0xff] }
 0x2a3   :  { %769 = vrcp.f32 %v591_v11 }
 0x2b0   :  { %v770_v22 = vpop.eup %769 }
 0x2b1   :  { %v597_v31 = vrot.slane %v770_v22, %v596_v59  ;;  %v616_v52 = vrot.slane %v770_v22, %v615_v17  ;;  %v635_v42 = vrot.slane %v770_v22, %v634_v51  ;;  %v654_v35 = vrot.slane %v770_v22, %v653_v29 }
 0x2b3   :  { %603 = vbcast.lane.b32.xlu0 %v597_v31, 264  ;;  %599 = vbcast.lane.b32.xlu1 %v597_v31, 256 }
 0x2b7   :  { %611 = vbcast.lane.b32.xlu0 %v597_v31, 280  ;;  %607 = vbcast.lane.b32.xlu1 %v597_v31, 272 }
 0x2bb   :  { %622 = vbcast.lane.b32.xlu0 %v616_v52, 264  ;;  %618 = vbcast.lane.b32.xlu1 %v616_v52, 256 }
 0x2bf   :  { %630 = vbcast.lane.b32.xlu0 %v616_v52, 280  ;;  %626 = vbcast.lane.b32.xlu1 %v616_v52, 272 }
 0x2c3   :  { %641 = vbcast.lane.b32.xlu0 %v635_v42, 264  ;;  %637 = vbcast.lane.b32.xlu1 %v635_v42, 256 }
 0x2c7   :  { %649 = vbcast.lane.b32.xlu0 %v635_v42, 280  ;;  %645 = vbcast.lane.b32.xlu1 %v635_v42, 272 }
 0x2cb   :  { %660 = vbcast.lane.b32.xlu0 %v654_v35, 264  ;;  %656 = vbcast.lane.b32.xlu1 %v654_v35, 256 }
 0x2cf   :  { %668 = vbcast.lane.b32.xlu0 %v654_v35, 280  ;;  %664 = vbcast.lane.b32.xlu1 %v654_v35, 272 }
 0x325   :  { %v604_v63 = vpop.permute.xlu0 %603  ;;  %v600_v34 = vpop.permute.xlu1 %599 }
 0x326   :  { %v672_v53 = vmul.f32 %v604_v63, %v883_v8  ;;  %v673_v49 = vmul.f32 %v604_v63, %v885_v9  ;;  %v670_v60 = vmul.f32 %v600_v34, %v871_v2  ;;  %v671_v43 = vmul.f32 %v600_v34, %v875_v4 }
 0x328   :  { %704 = vst [vmem:[#allocation5 + $0x10] sm:$0xff] %v672_v53  ;;  %705 = vst [vmem:[#allocation5 + $0x18] sm:$0xff] %v673_v49 }
 0x329   :  { %702 = vst [vmem:[#allocation5] sm:$0xff] %v670_v60  ;;  %703 = vst [vmem:[#allocation5 + $0x8] sm:$0xff] %v671_v43  ;;  %v612_v23 = vpop.permute.xlu0 %611  ;;  %v608_v56 = vpop.permute.xlu1 %607 }
 0x32a   :  { %v676_v58 = vmul.f32 %v612_v23, %v919_v26  ;;  %v677_v54 = vmul.f32 %v612_v23, %v921_v27  ;;  %v674_v16 = vmul.f32 %v608_v56, %v895_v14  ;;  %v675_v8 = vmul.f32 %v608_v56, %v897_v15 }
 0x32c   :  { %708 = vst [vmem:[#allocation5 + $0x30] sm:$0xff] %v676_v58  ;;  %709 = vst [vmem:[#allocation5 + $0x38] sm:$0xff] %v677_v54 }
 0x32d   :  { %706 = vst [vmem:[#allocation5 + $0x20] sm:$0xff] %v674_v16  ;;  %707 = vst [vmem:[#allocation5 + $0x28] sm:$0xff] %v675_v8  ;;  %v623_v2 = vpop.permute.xlu0 %622  ;;  %v619_v4 = vpop.permute.xlu1 %618 }
 0x32e   :  { %v680_v9 = vmul.f32 %v623_v2, %v877_v5  ;;  %v681_v28 = vmul.f32 %v623_v2, %v879_v6  ;;  %v678_v40 = vmul.f32 %v619_v4, %v867_v0  ;;  %v679_v26 = vmul.f32 %v619_v4, %v869_v1 }
 0x330   :  { %712 = vst [vmem:[#allocation5 + $0x50] sm:$0xff] %v680_v9  ;;  %713 = vst [vmem:[#allocation5 + $0x58] sm:$0xff] %v681_v28 }
 0x331   :  { %710 = vst [vmem:[#allocation5 + $0x40] sm:$0xff] %v678_v40  ;;  %711 = vst [vmem:[#allocation5 + $0x48] sm:$0xff] %v679_v26  ;;  %v631_v14 = vpop.permute.xlu0 %630  ;;  %v627_v15 = vpop.permute.xlu1 %626 }
 0x332   :  { %v684_v27 = vmul.f32 %v631_v14, %v915_v24  ;;  %v685_v44 = vmul.f32 %v631_v14, %v917_v25  ;;  %v682_v48 = vmul.f32 %v627_v15, %v891_v12  ;;  %v683_v5 = vmul.f32 %v627_v15, %v893_v13 }
 0x334   :  { %716 = vst [vmem:[#allocation5 + $0x70] sm:$0xff] %v684_v27  ;;  %717 = vst [vmem:[#allocation5 + $0x78] sm:$0xff] %v685_v44 }
 0x335   :  { %714 = vst [vmem:[#allocation5 + $0x60] sm:$0xff] %v682_v48  ;;  %715 = vst [vmem:[#allocation5 + $0x68] sm:$0xff] %v683_v5  ;;  %v642_v0 = vpop.permute.xlu0 %641  ;;  %v638_v1 = vpop.permute.xlu1 %637 }
 0x336   :  { %v688_v6 = vmul.f32 %v642_v0, %v903_v18  ;;  %v689_v55 = vmul.f32 %v642_v0, %v905_v19  ;;  %v686_v45 = vmul.f32 %v638_v1, %v907_v20  ;;  %v687_v24 = vmul.f32 %v638_v1, %v909_v21 }
 0x338   :  { %720 = vst [vmem:[#allocation5 + $0x90] sm:$0xff] %v688_v6  ;;  %721 = vst [vmem:[#allocation5 + $0x98] sm:$0xff] %v689_v55 }
 0x339   :  { %718 = vst [vmem:[#allocation5 + $0x80] sm:$0xff] %v686_v45  ;;  %719 = vst [vmem:[#allocation5 + $0x88] sm:$0xff] %v687_v24  ;;  %v650_v12 = vpop.permute.xlu0 %649  ;;  %v646_v13 = vpop.permute.xlu1 %645 }
 0x33a   :  { %v692_v25 = vmul.f32 %v650_v12, %v939_v36  ;;  %v693_v46 = vmul.f32 %v650_v12, %v941_v37  ;;  %v690_v61 = vmul.f32 %v646_v13, %v931_v32  ;;  %v691_v18 = vmul.f32 %v646_v13, %v933_v33  ;;  %v1144_v37 = vld [vmem:[#allocation9_spill] sm:$0xff] }
 0x33c   :  { %724 = vst [vmem:[#allocation5 + $0xb0] sm:$0xff] %v692_v25  ;;  %725 = vst [vmem:[#allocation5 + $0xb8] sm:$0xff] %v693_v46 }
 0x33d   :  { %722 = vst [vmem:[#allocation5 + $0xa0] sm:$0xff] %v690_v61  ;;  %723 = vst [vmem:[#allocation5 + $0xa8] sm:$0xff] %v691_v18  ;;  %v661_v19 = vpop.permute.xlu0 %660  ;;  %v657_v20 = vpop.permute.xlu1 %656 }
 0x33e   :  { %v696_v21 = vmul.f32 %v661_v19, %v943_v38  ;;  %v697_v47 = vmul.f32 %v661_v19, %v945_v39  ;;  %v694_v50 = vmul.f32 %v657_v20, %v927_v30  ;;  %v695_v36 = vmul.f32 %v657_v20, %v1143_v7 }
 0x340   :  { %728 = vst [vmem:[#allocation5 + $0xd0] sm:$0xff] %v696_v21  ;;  %729 = vst [vmem:[#allocation5 + $0xd8] sm:$0xff] %v697_v47 }
 0x341   :  { %726 = vst [vmem:[#allocation5 + $0xc0] sm:$0xff] %v694_v50  ;;  %727 = vst [vmem:[#allocation5 + $0xc8] sm:$0xff] %v695_v36  ;;  %v669_v32 = vpop.permute.xlu0 %668  ;;  %v665_v33 = vpop.permute.xlu1 %664 }
 0x342   :  { %v700_v10 = vmul.f32 %v669_v32, %v1144_v37  ;;  %v701_v41 = vmul.f32 %v669_v32, %v1145_v57  ;;  %v698_v38 = vmul.f32 %v665_v33, %v1146_v62  ;;  %v699_v39 = vmul.f32 %v665_v33, %v1147_v3 }
 0x344   :  { %732 = vst [vmem:[#allocation5 + $0xf0] sm:$0xff] %v700_v10  ;;  %733 = vst [vmem:[#allocation5 + $0xf8] sm:$0xff] %v701_v41 }
 0x345   :  { %730 = vst [vmem:[#allocation5 + $0xe0] sm:$0xff] %v698_v38  ;;  %731 = vst [vmem:[#allocation5 + $0xe8] sm:$0xff] %v699_v39 }
 0x346   :  { %802 = shalt.err (!%p799_p9)
}
 0x347   :  { %745 = dma.vmem_to_hbm [thread:$0]  %s740_s6, 4096, %s1132_s7, [#allocation4], %s816_s27, %s816_s27, %s817_s28  }
 0x348   :  { %813 = dma.done.wait [#allocation4], 4096  }
 0x349   :  { %814 = vsyncadd [#allocation4], 4294963200 }
 0x34a   :  { %749 = vsyncpa [#allocation3], 1 }
 0x34b   :  { %750 = vsyncpa [#allocation4], 1 }

</bundles_post_ra>
